<compile_context>
chip_gen: v7x
topology: tpu7x:2x2x1
jax: 0.10.0
libtpu: 0.0.40
codegen_flags: <defaults>
</compile_context>

<pallas_src>
import functools
import math

import jax
import jax.numpy as jnp
from jax import lax
from jax.experimental import pallas as pl
from jax.experimental.pallas import tpu as pltpu

LANES = 128
MAX_TILE_ROWS = 4096          # (4096, 128) f32 tile = 2 MiB
NUM_CORES = 2                 # leading "parallel" axis; v7x has 2 TCs/chip
_OUT_ROWS = 8                 # one aligned (8,128) output slab per (core, pair)


def _cdiv(a, b):
    return -(-a // b)


def _round_up(x, m):
    return _cdiv(x, m) * m


def _fused_ssd_kernel(x0, y0, x1, y1, x2, y2, o_ref, acc_ref, *,
                      tile_rows, segs):
    """Per-core partial sum((x - y)^2) for 3 pairs, one pair segment at a time.

    Grid: (core c, inner i).  Pair p owns inner indices [s_p, e_p); on core c
    the global tile processed at inner index i is g = c*h0_p + (i - s_p).
    Tiles with g >= t_p (possible only on core 1 when a pair has an odd tile
    count) contribute nothing.  acc_ref is a single (8, 128) f32 slab; every
    tile folds into it with cross-vreg adds and the full cross-lane reduction
    runs once per pair per core at the pair boundary.
    """
    c = pl.program_id(0)
    i = pl.program_id(1)
    pair_refs = ((x0, y0), (x1, y1), (x2, y2))

    for p, ((x_ref, y_ref), seg) in enumerate(zip(pair_refs, segs)):
        s, e, h0, t, rows_in_last, ragged = seg
        t_full = t - 1 if ragged else t          # count of fully-valid tiles

        in_range = (i >= s) & (i < e)
        g = c * h0 + (i - s)                     # this core's global tile idx

        @pl.when(i == s)
        def _zero():                             # entering pair p on this core
            acc_ref[...] = jnp.zeros_like(acc_ref)

        if t_full > 0:
            @pl.when(in_range & (g < t_full))
            def _interior():                     # unmasked fast path
                d = (x_ref[...].astype(jnp.float32)
                     - y_ref[...].astype(jnp.float32))
                sq = d * d
                acc_ref[...] += jnp.sum(
                    sq.reshape(tile_rows // 8, 8, LANES), axis=0)

        if ragged:
            vr = _round_up(rows_in_last, 8)      # static slice of the tail

            @pl.when(in_range & (g == t - 1))
            def _tail():                         # runs once per pair (one core)
                d = (x_ref[0:vr, :].astype(jnp.float32)
                     - y_ref[0:vr, :].astype(jnp.float32))
                row_ids = lax.broadcasted_iota(jnp.int32, (vr, LANES), 0)
                sq = jnp.where(row_ids < rows_in_last, d * d, 0.0)
                acc_ref[...] += jnp.sum(sq.reshape(vr // 8, 8, LANES), axis=0)

        @pl.when(i == e - 1)
        def _write():                            # pair boundary: reduce + store
            o_ref[p * _OUT_ROWS:(p + 1) * _OUT_ROWS, :] = jnp.full(
                (_OUT_ROWS, LANES), jnp.sum(acc_ref[...]), dtype=jnp.float32)


def fused_sum_sq_diff(pairs):
    """pairs: exactly 3 (x, y) tuples with x.shape == y.shape.

    Returns float32 (3,): [sum((x_p - y_p)^2) for p in 0..2], computed in a
    single pallas_call (MSELoss(reduce=True, size_average=False) semantics).
    """
    assert len(pairs) == 3
    sizes = []
    for x, y in pairs:
        assert x.shape == y.shape, (x.shape, y.shape)
        n = math.prod(x.shape)
        assert n > 0, "LIH_Loss: zero-sized tensors are not supported"
        sizes.append(n)

    # Sublane packing multiple across all streamed dtypes (8 f32 / 16 bf16 / 32 i8).
    mult = 8
    for x, y in pairs:
        for a in (x, y):
            bits = jnp.dtype(a.dtype).itemsize * 8
            mult = max(mult, 8 * max(1, 32 // bits))

    def to_2d(a, n):
        flat = a.reshape(-1)
        rem = n % LANES
        if rem:
            # TODO(synk): only the rare non-multiple-of-128 case pays a small pad copy.
            flat = jnp.pad(flat, (0, LANES - rem))
        return flat.reshape(-1, LANES)

    xs = [to_2d(x, n) for (x, _), n in zip(pairs, sizes)]
    ys = [to_2d(y, n) for (_, y), n in zip(pairs, sizes)]
    rows = [_cdiv(n, LANES) for n in sizes]

    # Adaptive tile: large for big tensors, shrunk for small ones, aligned to
    # the packed sublane multiple of the streamed dtypes.
    tile_rows = min(MAX_TILE_ROWS, _round_up(max(rows), mult))

    # Static per-pair segment + per-core split parameters.
    segs = []                      # (start, end, h0, t, rows_in_last, ragged)
    maps = []
    inner_total = 0
    for r in rows:
        t = _cdiv(r, tile_rows)
        h0 = _cdiv(t, 2)                        # core 0 takes the ceil half
        s, e = inner_total, inner_total + h0
        inner_total = e
        rows_in_last = r - (t - 1) * tile_rows
        segs.append((s, e, h0, t, rows_in_last, rows_in_last != tile_rows))

        def make_map(s=s, m=h0, h0_=h0, t_=t):
            # Clamped outside [s, e): constant block index -> Pallas skips DMA.
            def index_map(c, i):
                local = jnp.clip(i - s, 0, m - 1)
                return (jnp.clip(c * h0_ + local, 0, t_ - 1), 0)
            return index_map

        maps.append(make_map())

    in_specs = []
    operands = []
    for p in range(3):
        in_specs += [pl.BlockSpec((tile_rows, LANES), maps[p]),
                     pl.BlockSpec((tile_rows, LANES), maps[p])]
        operands += [xs[p], ys[p]]

    kernel = functools.partial(_fused_ssd_kernel,
                               tile_rows=tile_rows, segs=tuple(segs))

    out = pl.pallas_call(
        kernel,
        out_shape=jax.ShapeDtypeStruct((NUM_CORES * 3 * _OUT_ROWS, LANES),
                                       jnp.float32),
        grid=(NUM_CORES, inner_total),
        in_specs=in_specs,
        # One resident (24, 128) block per core; each pair's slab is written
        # once at that pair's last inner step.
        out_specs=pl.BlockSpec((3 * _OUT_ROWS, LANES), lambda c, i: (c, 0)),
        scratch_shapes=[pltpu.VMEM((_OUT_ROWS, LANES), jnp.float32)],
        compiler_params=pltpu.CompilerParams(
            dimension_semantics=("parallel", "arbitrary"),
            vmem_limit_bytes=48 * 1024 * 1024,
        ),
    )(*operands)

    # Row 0 / lane 0 of each slab: [c0p0, c0p1, c0p2, c1p0, c1p1, c1p2].
    partials = out[0::_OUT_ROWS, 0].reshape(NUM_CORES, 3)
    return jnp.sum(partials, axis=0)


def lih_loss(secret, cover, stego, rec, steg_low, cover_low,
             rec_weight, guide_weight, freq_weight):
    """JAX/Pallas equivalent of LIH_Loss.forward (sum-of-squared-errors MSE)."""
    sums = fused_sum_sq_diff([(stego, cover), (rec, secret),
                              (steg_low, cover_low)])
    guide_loss = sums[0]
    reconstruction_loss = sums[1]
    freq_loss = sums[2]
    hide_loss = (rec_weight * reconstruction_loss
                 + freq_weight * freq_loss
                 + guide_weight * guide_loss)
    return {
        'g_loss': guide_loss,
        'r_loss': reconstruction_loss,
        'f_loss': freq_loss,
        'hide_loss': hide_loss,
    }


if __name__ == "__main__":
    key = jax.random.PRNGKey(0)
    ks = jax.random.split(key, 6)

    # NCHW shapes consistent with the module's forward signature
    N, C, H, W = 2, 4, 16, 16
    secret = jax.random.normal(ks[0], (N, C, H, W), dtype=jnp.float32)
    cover = jax.random.normal(ks[1], (N, C, H, W), dtype=jnp.float32)
    stego = jax.random.normal(ks[2], (N, C, H, W), dtype=jnp.float32)
    rec = jax.random.normal(ks[3], (N, C, H, W), dtype=jnp.float32)
    # "low frequency" tensors: half spatial resolution
    steg_low = jax.random.normal(ks[4], (N, C, H // 2, W // 2), dtype=jnp.float32)
    cover_low = jax.random.normal(ks[5], (N, C, H // 2, W // 2), dtype=jnp.float32)

    rec_weight, guide_weight, freq_weight = 1.0, 1.0, 0.5

    out = lih_loss(secret, cover, stego, rec, steg_low, cover_low,
                   rec_weight, guide_weight, freq_weight)
    out = jax.tree_util.tree_map(jax.block_until_ready, out)

    # reference check (pure JAX, sum-of-squared-errors semantics)
    def ref_ssd(a, b):
        return jnp.sum((a.astype(jnp.float32) - b.astype(jnp.float32)) ** 2)

    g_ref = ref_ssd(stego, cover)
    r_ref = ref_ssd(rec, secret)
    f_ref = ref_ssd(steg_low, cover_low)
    h_ref = rec_weight * r_ref + freq_weight * f_ref + guide_weight * g_ref

    assert jnp.allclose(out['g_loss'], g_ref, rtol=1e-5, atol=1e-3)
    assert jnp.allclose(out['r_loss'], r_ref, rtol=1e-5, atol=1e-3)
    assert jnp.allclose(out['f_loss'], f_ref, rtol=1e-5, atol=1e-3)
    assert jnp.allclose(out['hide_loss'], h_ref, rtol=1e-5, atol=1e-3)

    print("KERNEL_OK")
</pallas_src>

<mosaic_0001>
module attributes {stable_mosaic.version = 11 : i64} {
  func.func @_fused_ssd_kernel(%arg0: i32, %arg1: i32, %arg2: memref<16x128xf32, #tpu.memory_space<vmem>>, %arg3: memref<16x128xf32, #tpu.memory_space<vmem>>, %arg4: memref<16x128xf32, #tpu.memory_space<vmem>>, %arg5: memref<16x128xf32, #tpu.memory_space<vmem>>, %arg6: memref<16x128xf32, #tpu.memory_space<vmem>>, %arg7: memref<16x128xf32, #tpu.memory_space<vmem>>, %arg8: memref<24x128xf32, #tpu.memory_space<vmem>>, %arg9: memref<8x128xf32, #tpu.memory_space<vmem>>) attributes {dimension_semantics = [#tpu.dimension_semantics<parallel>, #tpu.dimension_semantics<arbitrary>], iteration_bounds = array<i64: 2, 3>, scalar_prefetch = 0 : i64, scratch_operands = 1 : i64, tpu.core_type = #tpu.core_type<tc>, window_params = [{transform_indices = @transform_0, window_bounds = array<i64: 16, 128>}, {transform_indices = @transform_1, window_bounds = array<i64: 16, 128>}, {transform_indices = @transform_2, window_bounds = array<i64: 16, 128>}, {transform_indices = @transform_3, window_bounds = array<i64: 16, 128>}, {transform_indices = @transform_4, window_bounds = array<i64: 16, 128>}, {transform_indices = @transform_5, window_bounds = array<i64: 16, 128>}, {transform_indices = @transform_6, window_bounds = array<i64: 24, 128>}]} {
    %c0_i32 = arith.constant 0 : i32
    %0 = arith.cmpi sge, %arg1, %c0_i32 : i32
    %c1_i32 = arith.constant 1 : i32
    %1 = arith.cmpi slt, %arg1, %c1_i32 : i32
    %2 = arith.andi %0, %1 : i1
    %c1_i32_0 = arith.constant 1 : i32
    %3 = arith.muli %arg0, %c1_i32_0 : i32
    %c0_i32_1 = arith.constant 0 : i32
    %4 = arith.subi %arg1, %c0_i32_1 : i32
    %5 = arith.addi %3, %4 : i32
    %c0_i32_2 = arith.constant 0 : i32
    %6 = arith.cmpi eq, %arg1, %c0_i32_2 : i32
    %7 = arith.extui %6 : i1 to i32
    %c0_i32_3 = arith.constant 0 : i32
    %8 = arith.cmpi ne, %7, %c0_i32_3 : i32
    scf.if %8 {
      %cst = arith.constant 0.000000e+00 : f32
      %48 = vector.broadcast %cst : f32 to vector<8x128xf32>
      %c0 = arith.constant 0 : index
      %c0_26 = arith.constant 0 : index
      %49 = vector.load %arg9[%c0, %c0_26] : memref<8x128xf32, #tpu.memory_space<vmem>>, vector<8x128xf32>
      tpu.vector_store %arg9[%c0, %c0_26], %48 {strides = array<i32>} : memref<8x128xf32, #tpu.memory_space<vmem>>, vector<8x128xf32>,
    } else {
    }
    %c1_i32_4 = arith.constant 1 : i32
    %9 = arith.cmpi slt, %5, %c1_i32_4 : i32
    %10 = arith.andi %2, %9 : i1
    %11 = arith.extui %10 : i1 to i32
    %c0_i32_5 = arith.constant 0 : i32
    %12 = arith.cmpi ne, %11, %c0_i32_5 : i32
    scf.if %12 {
      %c0 = arith.constant 0 : index
      %c0_26 = arith.constant 0 : index
      %48 = vector.load %arg2[%c0, %c0_26] : memref<16x128xf32, #tpu.memory_space<vmem>>, vector<16x128xf32>
      %c0_27 = arith.constant 0 : index
      %c0_28 = arith.constant 0 : index
      %49 = vector.load %arg3[%c0_27, %c0_28] : memref<16x128xf32, #tpu.memory_space<vmem>>, vector<16x128xf32>
      %50 = arith.subf %48, %49 : vector<16x128xf32>
      %51 = arith.mulf %50, %50 : vector<16x128xf32>
      %c0_29 = arith.constant 0 : index
      %c0_30 = arith.constant 0 : index
      %52 = vector.load %arg9[%c0_29, %c0_30] : memref<8x128xf32, #tpu.memory_space<vmem>>, vector<8x128xf32>
      %53 = vector.shape_cast %51 : vector<16x128xf32> to vector<2x8x128xf32>
      %cst = arith.constant dense<0.000000e+00> : vector<8x128xf32>
      %54 = vector.multi_reduction <add>, %53, %cst [0] : vector<2x8x128xf32> to vector<8x128xf32>
      %55 = arith.addf %52, %54 : vector<8x128xf32>
      %c0_31 = arith.constant 0 : index
      %c0_32 = arith.constant 0 : index
      %56 = vector.load %arg9[%c0_31, %c0_32] : memref<8x128xf32, #tpu.memory_space<vmem>>, vector<8x128xf32>
      tpu.vector_store %arg9[%c0_31, %c0_32], %55 {strides = array<i32>} : memref<8x128xf32, #tpu.memory_space<vmem>>, vector<8x128xf32>,
    } else {
    }
    %c0_i32_6 = arith.constant 0 : i32
    %13 = arith.cmpi eq, %arg1, %c0_i32_6 : i32
    %14 = arith.extui %13 : i1 to i32
    %c0_i32_7 = arith.constant 0 : i32
    %15 = arith.cmpi ne, %14, %c0_i32_7 : i32
    scf.if %15 {
      %c0 = arith.constant 0 : index
      %c0_26 = arith.constant 0 : index
      %48 = vector.load %arg9[%c0, %c0_26] : memref<8x128xf32, #tpu.memory_space<vmem>>, vector<8x128xf32>
      %49 = vector.shape_cast %48 : vector<8x128xf32> to vector<1x8x128xf32>
      %cst = arith.constant dense<0.000000e+00> : vector<1xf32>
      %50 = vector.multi_reduction <add>, %49, %cst [1, 2] : vector<1x8x128xf32> to vector<1xf32>
      %51 = vector.shape_cast %50 : vector<1xf32> to vector<1x1x1xf32>
      %52 = vector.extract %51[0, 0, 0] : f32 from vector<1x1x1xf32>
      %53 = vector.broadcast %52 : f32 to vector<8x128xf32>
      %c0_27 = arith.constant 0 : index
      %c0_28 = arith.constant 0 : index
      %54 = vector.load %arg8[%c0_27, %c0_28] : memref<24x128xf32, #tpu.memory_space<vmem>>, vector<8x128xf32>
      tpu.vector_store %arg8[%c0_27, %c0_28], %53 {strides = array<i32>} : memref<24x128xf32, #tpu.memory_space<vmem>>, vector<8x128xf32>,
    } else {
    }
    %c1_i32_8 = arith.constant 1 : i32
    %16 = arith.cmpi sge, %arg1, %c1_i32_8 : i32
    %c2_i32 = arith.constant 2 : i32
    %17 = arith.cmpi slt, %arg1, %c2_i32 : i32
    %18 = arith.andi %16, %17 : i1
    %c1_i32_9 = arith.constant 1 : i32
    %19 = arith.muli %arg0, %c1_i32_9 : i32
    %c1_i32_10 = arith.constant 1 : i32
    %20 = arith.subi %arg1, %c1_i32_10 : i32
    %21 = arith.addi %19, %20 : i32
    %c1_i32_11 = arith.constant 1 : i32
    %22 = arith.cmpi eq, %arg1, %c1_i32_11 : i32
    %23 = arith.extui %22 : i1 to i32
    %c0_i32_12 = arith.constant 0 : i32
    %24 = arith.cmpi ne, %23, %c0_i32_12 : i32
    scf.if %24 {
      %cst = arith.constant 0.000000e+00 : f32
      %48 = vector.broadcast %cst : f32 to vector<8x128xf32>
      %c0 = arith.constant 0 : index
      %c0_26 = arith.constant 0 : index
      %49 = vector.load %arg9[%c0, %c0_26] : memref<8x128xf32, #tpu.memory_space<vmem>>, vector<8x128xf32>
      tpu.vector_store %arg9[%c0, %c0_26], %48 {strides = array<i32>} : memref<8x128xf32, #tpu.memory_space<vmem>>, vector<8x128xf32>,
    } else {
    }
    %c1_i32_13 = arith.constant 1 : i32
    %25 = arith.cmpi slt, %21, %c1_i32_13 : i32
    %26 = arith.andi %18, %25 : i1
    %27 = arith.extui %26 : i1 to i32
    %c0_i32_14 = arith.constant 0 : i32
    %28 = arith.cmpi ne, %27, %c0_i32_14 : i32
    scf.if %28 {
      %c0 = arith.constant 0 : index
      %c0_26 = arith.constant 0 : index
      %48 = vector.load %arg4[%c0, %c0_26] : memref<16x128xf32, #tpu.memory_space<vmem>>, vector<16x128xf32>
      %c0_27 = arith.constant 0 : index
      %c0_28 = arith.constant 0 : index
      %49 = vector.load %arg5[%c0_27, %c0_28] : memref<16x128xf32, #tpu.memory_space<vmem>>, vector<16x128xf32>
      %50 = arith.subf %48, %49 : vector<16x128xf32>
      %51 = arith.mulf %50, %50 : vector<16x128xf32>
      %c0_29 = arith.constant 0 : index
      %c0_30 = arith.constant 0 : index
      %52 = vector.load %arg9[%c0_29, %c0_30] : memref<8x128xf32, #tpu.memory_space<vmem>>, vector<8x128xf32>
      %53 = vector.shape_cast %51 : vector<16x128xf32> to vector<2x8x128xf32>
      %cst = arith.constant dense<0.000000e+00> : vector<8x128xf32>
      %54 = vector.multi_reduction <add>, %53, %cst [0] : vector<2x8x128xf32> to vector<8x128xf32>
      %55 = arith.addf %52, %54 : vector<8x128xf32>
      %c0_31 = arith.constant 0 : index
      %c0_32 = arith.constant 0 : index
      %56 = vector.load %arg9[%c0_31, %c0_32] : memref<8x128xf32, #tpu.memory_space<vmem>>, vector<8x128xf32>
      tpu.vector_store %arg9[%c0_31, %c0_32], %55 {strides = array<i32>} : memref<8x128xf32, #tpu.memory_space<vmem>>, vector<8x128xf32>,
    } else {
    }
    %c1_i32_15 = arith.constant 1 : i32
    %29 = arith.cmpi eq, %arg1, %c1_i32_15 : i32
    %30 = arith.extui %29 : i1 to i32
    %c0_i32_16 = arith.constant 0 : i32
    %31 = arith.cmpi ne, %30, %c0_i32_16 : i32
    scf.if %31 {
      %c0 = arith.constant 0 : index
      %c0_26 = arith.constant 0 : index
      %48 = vector.load %arg9[%c0, %c0_26] : memref<8x128xf32, #tpu.memory_space<vmem>>, vector<8x128xf32>
      %49 = vector.shape_cast %48 : vector<8x128xf32> to vector<1x8x128xf32>
      %cst = arith.constant dense<0.000000e+00> : vector<1xf32>
      %50 = vector.multi_reduction <add>, %49, %cst [1, 2] : vector<1x8x128xf32> to vector<1xf32>
      %51 = vector.shape_cast %50 : vector<1xf32> to vector<1x1x1xf32>
      %52 = vector.extract %51[0, 0, 0] : f32 from vector<1x1x1xf32>
      %53 = vector.broadcast %52 : f32 to vector<8x128xf32>
      %c8 = arith.constant 8 : index
      %c0_27 = arith.constant 0 : index
      %54 = vector.load %arg8[%c8, %c0_27] : memref<24x128xf32, #tpu.memory_space<vmem>>, vector<8x128xf32>
      tpu.vector_store %arg8[%c8, %c0_27], %53 {strides = array<i32>} : memref<24x128xf32, #tpu.memory_space<vmem>>, vector<8x128xf32>,
    } else {
    }
    %c2_i32_17 = arith.constant 2 : i32
    %32 = arith.cmpi sge, %arg1, %c2_i32_17 : i32
    %c3_i32 = arith.constant 3 : i32
    %33 = arith.cmpi slt, %arg1, %c3_i32 : i32
    %34 = arith.andi %32, %33 : i1
    %c1_i32_18 = arith.constant 1 : i32
    %35 = arith.muli %arg0, %c1_i32_18 : i32
    %c2_i32_19 = arith.constant 2 : i32
    %36 = arith.subi %arg1, %c2_i32_19 : i32
    %37 = arith.addi %35, %36 : i32
    %c2_i32_20 = arith.constant 2 : i32
    %38 = arith.cmpi eq, %arg1, %c2_i32_20 : i32
    %39 = arith.extui %38 : i1 to i32
    %c0_i32_21 = arith.constant 0 : i32
    %40 = arith.cmpi ne, %39, %c0_i32_21 : i32
    scf.if %40 {
      %cst = arith.constant 0.000000e+00 : f32
      %48 = vector.broadcast %cst : f32 to vector<8x128xf32>
      %c0 = arith.constant 0 : index
      %c0_26 = arith.constant 0 : index
      %49 = vector.load %arg9[%c0, %c0_26] : memref<8x128xf32, #tpu.memory_space<vmem>>, vector<8x128xf32>
      tpu.vector_store %arg9[%c0, %c0_26], %48 {strides = array<i32>} : memref<8x128xf32, #tpu.memory_space<vmem>>, vector<8x128xf32>,
    } else {
    }
    %c0_i32_22 = arith.constant 0 : i32
    %41 = arith.cmpi eq, %37, %c0_i32_22 : i32
    %42 = arith.andi %34, %41 : i1
    %43 = arith.extui %42 : i1 to i32
    %c0_i32_23 = arith.constant 0 : i32
    %44 = arith.cmpi ne, %43, %c0_i32_23 : i32
    scf.if %44 {
      %c0 = arith.constant 0 : index
      %c0_26 = arith.constant 0 : index
      %48 = vector.load %arg6[%c0, %c0_26] : memref<16x128xf32, #tpu.memory_space<vmem>>, vector<8x128xf32>
      %c0_27 = arith.constant 0 : index
      %c0_28 = arith.constant 0 : index
      %49 = vector.load %arg7[%c0_27, %c0_28] : memref<16x128xf32, #tpu.memory_space<vmem>>, vector<8x128xf32>
      %50 = arith.subf %48, %49 : vector<8x128xf32>
      %51 = tpu.iota {dimensions = array<i32: 0>} : vector<8x128xi32>
      %c4_i32 = arith.constant 4 : i32
      %52 = vector.broadcast %c4_i32 : i32 to vector<8x128xi32>
      %53 = arith.cmpi slt, %51, %52 : vector<8x128xi32>
      %54 = arith.mulf %50, %50 : vector<8x128xf32>
      %cst = arith.constant 0.000000e+00 : f32
      %55 = vector.broadcast %cst : f32 to vector<8x128xf32>
      %56 = arith.select %53, %54, %55 : vector<8x128xi1>, vector<8x128xf32>
      %c0_29 = arith.constant 0 : index
      %c0_30 = arith.constant 0 : index
      %57 = vector.load %arg9[%c0_29, %c0_30] : memref<8x128xf32, #tpu.memory_space<vmem>>, vector<8x128xf32>
      %58 = vector.shape_cast %56 : vector<8x128xf32> to vector<1x8x128xf32>
      %cst_31 = arith.constant dense<0.000000e+00> : vector<8x128xf32>
      %59 = vector.multi_reduction <add>, %58, %cst_31 [0] : vector<1x8x128xf32> to vector<8x128xf32>
      %60 = arith.addf %57, %59 : vector<8x128xf32>
      %c0_32 = arith.constant 0 : index
      %c0_33 = arith.constant 0 : index
      %61 = vector.load %arg9[%c0_32, %c0_33] : memref<8x128xf32, #tpu.memory_space<vmem>>, vector<8x128xf32>
      tpu.vector_store %arg9[%c0_32, %c0_33], %60 {strides = array<i32>} : memref<8x128xf32, #tpu.memory_space<vmem>>, vector<8x128xf32>,
    } else {
    }
    %c2_i32_24 = arith.constant 2 : i32
    %45 = arith.cmpi eq, %arg1, %c2_i32_24 : i32
    %46 = arith.extui %45 : i1 to i32
    %c0_i32_25 = arith.constant 0 : i32
    %47 = arith.cmpi ne, %46, %c0_i32_25 : i32
    scf.if %47 {
      %c0 = arith.constant 0 : index
      %c0_26 = arith.constant 0 : index
      %48 = vector.load %arg9[%c0, %c0_26] : memref<8x128xf32, #tpu.memory_space<vmem>>, vector<8x128xf32>
      %49 = vector.shape_cast %48 : vector<8x128xf32> to vector<1x8x128xf32>
      %cst = arith.constant dense<0.000000e+00> : vector<1xf32>
      %50 = vector.multi_reduction <add>, %49, %cst [1, 2] : vector<1x8x128xf32> to vector<1xf32>
      %51 = vector.shape_cast %50 : vector<1xf32> to vector<1x1x1xf32>
      %52 = vector.extract %51[0, 0, 0] : f32 from vector<1x1x1xf32>
      %53 = vector.broadcast %52 : f32 to vector<8x128xf32>
      %c16 = arith.constant 16 : index
      %c0_27 = arith.constant 0 : index
      %54 = vector.load %arg8[%c16, %c0_27] : memref<24x128xf32, #tpu.memory_space<vmem>>, vector<8x128xf32>
      tpu.vector_store %arg8[%c16, %c0_27], %53 {strides = array<i32>} : memref<24x128xf32, #tpu.memory_space<vmem>>, vector<8x128xf32>,
    } else {
    }
    return
  }
  func.func @transform_0(%arg0: i32, %arg1: i32) -> (i32, i32) {
    %c0_i32 = arith.constant 0 : i32
    %0 = arith.subi %arg1, %c0_i32 : i32
    %c0_i32_0 = arith.constant 0 : i32
    %c0_i32_1 = arith.constant 0 : i32
    %1 = arith.maxsi %c0_i32_0, %0 : i32
    %2 = arith.minsi %c0_i32_1, %1 : i32
    %c1_i32 = arith.constant 1 : i32
    %3 = arith.muli %arg0, %c1_i32 : i32
    %4 = arith.addi %3, %2 : i32
    %c0_i32_2 = arith.constant 0 : i32
    %c0_i32_3 = arith.constant 0 : i32
    %5 = arith.maxsi %c0_i32_2, %4 : i32
    %6 = arith.minsi %c0_i32_3, %5 : i32
    %c0_i32_4 = arith.constant 0 : i32
    %c0_i32_5 = arith.constant 0 : i32
    return %6, %c0_i32_4 : i32, i32
  }
  func.func @transform_1(%arg0: i32, %arg1: i32) -> (i32, i32) {
    %c0_i32 = arith.constant 0 : i32
    %0 = arith.subi %arg1, %c0_i32 : i32
    %c0_i32_0 = arith.constant 0 : i32
    %c0_i32_1 = arith.constant 0 : i32
    %1 = arith.maxsi %c0_i32_0, %0 : i32
    %2 = arith.minsi %c0_i32_1, %1 : i32
    %c1_i32 = arith.constant 1 : i32
    %3 = arith.muli %arg0, %c1_i32 : i32
    %4 = arith.addi %3, %2 : i32
    %c0_i32_2 = arith.constant 0 : i32
    %c0_i32_3 = arith.constant 0 : i32
    %5 = arith.maxsi %c0_i32_2, %4 : i32
    %6 = arith.minsi %c0_i32_3, %5 : i32
    %c0_i32_4 = arith.constant 0 : i32
    %c0_i32_5 = arith.constant 0 : i32
    return %6, %c0_i32_4 : i32, i32
  }
  func.func @transform_2(%arg0: i32, %arg1: i32) -> (i32, i32) {
    %c1_i32 = arith.constant 1 : i32
    %0 = arith.subi %arg1, %c1_i32 : i32
    %c0_i32 = arith.constant 0 : i32
    %c0_i32_0 = arith.constant 0 : i32
    %1 = arith.maxsi %c0_i32, %0 : i32
    %2 = arith.minsi %c0_i32_0, %1 : i32
    %c1_i32_1 = arith.constant 1 : i32
    %3 = arith.muli %arg0, %c1_i32_1 : i32
    %4 = arith.addi %3, %2 : i32
    %c0_i32_2 = arith.constant 0 : i32
    %c0_i32_3 = arith.constant 0 : i32
    %5 = arith.maxsi %c0_i32_2, %4 : i32
    %6 = arith.minsi %c0_i32_3, %5 : i32
    %c0_i32_4 = arith.constant 0 : i32
    %c0_i32_5 = arith.constant 0 : i32
    return %6, %c0_i32_4 : i32, i32
  }
  func.func @transform_3(%arg0: i32, %arg1: i32) -> (i32, i32) {
    %c1_i32 = arith.constant 1 : i32
    %0 = arith.subi %arg1, %c1_i32 : i32
    %c0_i32 = arith.constant 0 : i32
    %c0_i32_0 = arith.constant 0 : i32
    %1 = arith.maxsi %c0_i32, %0 : i32
    %2 = arith.minsi %c0_i32_0, %1 : i32
    %c1_i32_1 = arith.constant 1 : i32
    %3 = arith.muli %arg0, %c1_i32_1 : i32
    %4 = arith.addi %3, %2 : i32
    %c0_i32_2 = arith.constant 0 : i32
    %c0_i32_3 = arith.constant 0 : i32
    %5 = arith.maxsi %c0_i32_2, %4 : i32
    %6 = arith.minsi %c0_i32_3, %5 : i32
    %c0_i32_4 = arith.constant 0 : i32
    %c0_i32_5 = arith.constant 0 : i32
    return %6, %c0_i32_4 : i32, i32
  }
  func.func @transform_4(%arg0: i32, %arg1: i32) -> (i32, i32) {
    %c2_i32 = arith.constant 2 : i32
    %0 = arith.subi %arg1, %c2_i32 : i32
    %c0_i32 = arith.constant 0 : i32
    %c0_i32_0 = arith.constant 0 : i32
    %1 = arith.maxsi %c0_i32, %0 : i32
    %2 = arith.minsi %c0_i32_0, %1 : i32
    %c1_i32 = arith.constant 1 : i32
    %3 = arith.muli %arg0, %c1_i32 : i32
    %4 = arith.addi %3, %2 : i32
    %c0_i32_1 = arith.constant 0 : i32
    %c0_i32_2 = arith.constant 0 : i32
    %5 = arith.maxsi %c0_i32_1, %4 : i32
    %6 = arith.minsi %c0_i32_2, %5 : i32
    %c0_i32_3 = arith.constant 0 : i32
    %c0_i32_4 = arith.constant 0 : i32
    return %6, %c0_i32_3 : i32, i32
  }
  func.func @transform_5(%arg0: i32, %arg1: i32) -> (i32, i32) {
    %c2_i32 = arith.constant 2 : i32
    %0 = arith.subi %arg1, %c2_i32 : i32
    %c0_i32 = arith.constant 0 : i32
    %c0_i32_0 = arith.constant 0 : i32
    %1 = arith.maxsi %c0_i32, %0 : i32
    %2 = arith.minsi %c0_i32_0, %1 : i32
    %c1_i32 = arith.constant 1 : i32
    %3 = arith.muli %arg0, %c1_i32 : i32
    %4 = arith.addi %3, %2 : i32
    %c0_i32_1 = arith.constant 0 : i32
    %c0_i32_2 = arith.constant 0 : i32
    %5 = arith.maxsi %c0_i32_1, %4 : i32
    %6 = arith.minsi %c0_i32_2, %5 : i32
    %c0_i32_3 = arith.constant 0 : i32
    %c0_i32_4 = arith.constant 0 : i32
    return %6, %c0_i32_3 : i32, i32
  }
  func.func @transform_6(%arg0: i32, %arg1: i32) -> (i32, i32) {
    %c0_i32 = arith.constant 0 : i32
    %c0_i32_0 = arith.constant 0 : i32
    return %arg0, %c0_i32 : i32, i32
  }
}

</mosaic_0001>

<bundles_post_ra>
// kernel: tpu_custom_call.1
= control target key start
LH: loop header
LB: loop body
LE: loop exit
PB: predicated region body
PF: predicated region fallthrough
CT: control target
= control target key end

     0   :  { %11 = vsyncpa [#allocation4], 0  ;;  %s1986_s0 = inlined_call_operand.hbm [shape: f32[16,128], index: 0, kind: input, shape index: {}]   ;;  %s1987_s1 = inlined_call_operand.hbm [shape: f32[16,128], index: 1, kind: input, shape index: {}]   ;;  %s1988_s2 = inlined_call_operand.hbm [shape: f32[16,128], index: 2, kind: input, shape index: {}]   ;;  %s1989_s3 = inlined_call_operand.hbm [shape: f32[16,128], index: 3, kind: input, shape index: {}]   ;;  %s1990_s4 = inlined_call_operand.vmem [shape: f32[4,128], index: 4, kind: input, shape index: {}]   ;;  %s1991_s5 = inlined_call_operand.vmem [shape: f32[4,128], index: 5, kind: input, shape index: {}]   ;;  %s1992_s6 = inlined_call_operand.hbm [shape: f32[48,128], index: 6, kind: output, shape index: {}]  }
   0x1   :  { %13 = vsyncpa [#allocation4 + $0x1], 0 }
   0x2   :  { %14 = vsyncpa [#allocation7], 0 }
   0x3   :  { %16 = vsyncpa [#allocation7 + $0x1], 0 }
   0x4   :  { %17 = vsyncpa [#allocation10], 0 }
   0x5   :  { %19 = vsyncpa [#allocation10 + $0x1], 0 }
   0x6   :  { %20 = vsyncpa [#allocation5], 0 }
   0x7   :  { %22 = vsyncpa [#allocation5 + $0x1], 0  ;;  %s1683_s21 = smov 0   ;;  %s1685_s22 = smov 0  }
   0x8   :  { %s1687_s23 = smov 0   ;;  %s1689_s24 = smov 0  }
   0x9   :  { %s1691_s25 = smov 0   ;;  %s1693_s26 = smov 0  }
   0xa   :  { %s1695_s27 = smov 0   ;;  %s1697_s28 = smov 0  }
   0xb LB: > { %2000 = sst [smem:[#allocation16_spill]] %s1606_s21  ;;  %s1724_s29 = sadd.s32 4294967295, %s1634_s28   ;;  %s1634_s28 = sphi %s1697_s28, %s28_s28   ;;  %s1630_s27 = sphi %s1695_s27, %s2031_s27   ;;  %s1626_s26 = sphi %s1693_s26, %s2030_s26   ;;  %s1622_s25 = sphi %s1691_s25, %s2029_s25   ;;  %s1618_s24 = sphi %s1689_s24, %s2028_s24   ;;  %s1614_s23 = sphi %s1687_s23, %s2034_s23   ;;  %s1610_s22 = sphi %s1685_s22, %s2033_s22   ;;  %s1606_s21 = sphi %s1683_s21, %s2032_s21  }
   0xc   : > { %2001 = sst [smem:[#allocation17_spill]] %s1614_s23  ;;  %s1077_s30 = sadd.s32 4294967294, %s1634_s28  }
   0xd   : > { %2002 = sst [smem:[#allocation18_spill]] %s1626_s26  ;;  %s37_s7 = sadd.s32 1, %s1626_s26 }
   0xe   : > { %2003 = sst [smem:[#allocation19_spill]] %s1630_s27  ;;  %s40_s8 = sadd.s32 1, %s1630_s27 }
   0xf   : > { %p38_p0 = scmp.ge.s32.totalorder %s37_s7, 3  ;;  %p73_p1 = scmp.eq.s32.totalorder %s1634_s28, 0 }
  0x10   : > { %s319_s9 = sadd.s32 1, %s1614_s23  ;;  %p329_p3 = scmp.ne.s32.totalorder %s1614_s23, %s1610_s22 }
  0x11   : > { %s2036_s7 = smov (%p38_p0, %s37_s7), 0  ;;  %s2038_s8 = smov (!%p38_p0, %s40_s8), %s1630_s27 }
  0x12   : > { %2004 = sst [smem:[#allocation20_spill]] %s2036_s7  ;;  %p330_p4 = scmp.eq.s32.totalorder %s1724_s29, 5 }
  0x13   : > { %p42_p5 = scmp.ge.s32.totalorder %s2038_s8, 2  ;;  %p335_p6 = scmp.ne.s32.totalorder %s1610_s22, %s1606_s21 }
  0x14   : > { %p1740_p7 = por %p330_p4, %p329_p3  ;;  %p336_p8 = scmp.eq.s32.totalorder %s1077_s30, 5 }
  0x15   : > { %s2040_s8 = smov (%p42_p5, %s2038_s8), 0  ;;  %p1339_p10 = scmp.lt.s32.totalorder %s1634_s28, 6 }
  0x16   : > { %s2005_s10 = scalar_select %p1740_p7, 1, 0 }
  0x17   : > { %2006 = sst [smem:[#allocation21_spill]] %s2040_s8  ;;  %p1746_p9 = por %p336_p8, %p335_p6 }
  0x18   : > { %s316_s12 = ssub.s32 %s1630_s27, %s2040_s8  ;;  %p1755_p12 = pnand %p1339_p10, %p73_p1 }
  0x19   : > { %s2007_s11 = scalar_select %p1746_p9, 1, 0 }
  0x1a   : > { %p317_p11 = scmp.eq.s32.totalorder %s316_s12, 0  ;;  %s386_s15 = sand.u32 1, %s1634_s28  }
  0x1b   : > { %2008 = sst [smem:[#allocation22_spill]] %s2007_s11  ;;  %s1636_s16 = smov [#allocation6]  }
  0x1c   : > { %s1760_s14 = scalar_select %p317_p11, %s1614_s23, %s319_s9  }
  0x1d   : > { %s406_s17 = sshll.u32 %s1636_s16, 4  ;;  %s1765_s18 = scalar_lea.sflag [#allocation7], %s386_s15  ;;  %s407_s17 = int_to_ptr.vmem [resolvable:$true] %s406_s17 }
  0x1e   : > { %2010 = sst [smem:[#allocation23_spill]] %s1760_s14  ;;  %s1416_s30 = scalar_lea.hbm %s1987_s1, 256 }
  0x1f   : > { %p1417_p1 = scmp.ne.s32.totalorder %s1987_s1, %s1416_s30  ;;  %p1775_p3 = pneg %p1755_p12 }
  0x20   : > { %p1423_p6 = scmp.lt.u32.totalorder %s1416_s30, %s1987_s1 }
  0x21   : > { %p1419_p4 = pnand %p1775_p3, %p1417_p1 }
  0x23   : > { %p1420_p5 = pneg %p1419_p4 }
  0x25   : > { %p1425_p8 = pnand %p1423_p6, %p1420_p5 }
  0x27   : > { %1428 = shalt.err (!%p1425_p8)
}
  0x28   : > { %s1429_s19 = scalar_lea.vmem %s407_s17, 256  ;;  %s1436_s8 = scalar_lea.vmem %s407_s17, 512 }
  0x29   : > { %p1430_p10 = scmp.ne.s32.totalorder %s407_s17, %s1429_s19  ;;  %p1437_p13 = scmp.lt.s32.totalorder %s407_s17, %s407_s17 }
  0x2a   : > { %p1438_p0 = scmp.lt.s32.totalorder %s1436_s8, %s1429_s19 }
  0x2b   : > { %p1432_p11 = pnand %p1430_p10, %p1775_p3 }
  0x2c   : > { %p1439_p9 = por %p1438_p0, %p1437_p13 }
  0x2d   : > { %p1433_p2 = pneg %p1432_p11 }
  0x2f   : > { %p1440_p7 = pnand %p1439_p9, %p1433_p2 }
  0x31   : > { %1443 = shalt.err (!%p1440_p7)
}
  0x32   : > { %s1637_s20 = smov 128   ;;  %s1638_s30 = smov 8  }
  0x33   : > { %1328 = dma.hbm_to_vmem [thread:$0]  (!%p1755_p12), %s1987_s1, 256, %s407_s17, %s1765_s18, %s1637_s20, %s1637_s20, %s1638_s30  }
  0x34   : > { %p2012_p1 = scmp.lt.s32.totalorder %s1634_s28, 7  ;;  %p2013_p4 = scmp.ge.s32.totalorder %s1634_s28, 1 }
  0x35   : > { %s1639_s19 = smov [#allocation3]   ;;  %s1640_s7 = smov [#allocation8]  }
  0x36   : > { %p1799_p13 = pnand %p2013_p4, %p2012_p1  ;;  %s376_s8 = sshll.u32 %s1639_s19, 4  ;;  %s377_s8 = int_to_ptr.vmem [resolvable:$true] %s376_s8 }
  0x37   : > { %s437_s27 = sshll.u32 %s1640_s7, 4  ;;  %s1444_s23 = scalar_lea.hbm %s1986_s0, 256  ;;  %s438_s27 = int_to_ptr.vmem [resolvable:$true] %s437_s27 }
  0x38   : > { %s2014_s15 = scalar_select %p1799_p13, 1, 0 }
  0x39   : > { %p1445_p2 = scmp.ne.s32.totalorder %s1986_s0, %s1444_s23  ;;  %p1451_p0 = scmp.lt.u32.totalorder %s1444_s23, %s1986_s0 }
  0x3b   : > { %p1447_p7 = pnand %p1445_p2, %p1775_p3 }
  0x3d   : > { %p1448_p9 = pneg %p1447_p7 }
  0x3f   : > { %p1453_p5 = pnand %p1451_p0, %p1448_p9 }
  0x41   : > { %1456 = shalt.err (!%p1453_p5)
}
  0x42   : > { %s1457_s16 = scalar_lea.vmem %s377_s8, 256  ;;  %s1464_s26 = scalar_lea.vmem %s377_s8, 512 }
  0x43   : > { %p1458_p6 = scmp.ne.s32.totalorder %s377_s8, %s1457_s16  ;;  %p1465_p11 = scmp.lt.s32.totalorder %s377_s8, %s377_s8 }
  0x44   : > { %p1466_p1 = scmp.lt.s32.totalorder %s1464_s26, %s1457_s16 }
  0x45   : > { %p1460_p8 = pnand %p1458_p6, %p1775_p3 }
  0x46   : > { %p1467_p4 = por %p1466_p1, %p1465_p11 }
  0x47   : > { %p1461_p10 = pneg %p1460_p8 }
  0x49   : > { %p1468_p13 = pnand %p1467_p4, %p1461_p10 }
  0x4b   : > { %1471 = shalt.err (!%p1468_p13)
}
  0x4c   : > { %1325 = dma.hbm_to_vmem [thread:$0]  (!%p1755_p12), %s1986_s0, 256, %s377_s8, [#allocation4], %s1637_s20, %s1637_s20, %s1638_s30  }
  0x4d   : > { %s1472_s14 = scalar_lea.hbm %s1988_s2, 256 }
  0x4e   : > { %p1473_p2 = scmp.ne.s32.totalorder %s1988_s2, %s1472_s14  ;;  %p1479_p9 = scmp.lt.u32.totalorder %s1472_s14, %s1988_s2 }
  0x50   : > { %p1475_p13 = pnand %p1473_p2, %p1775_p3 }
  0x52   : > { %p1476_p7 = pneg %p1475_p13 }
  0x54   : > { %p1481_p0 = pnand %p1479_p9, %p1476_p7 }
  0x56   : > { %1484 = shalt.err (!%p1481_p0)
}
  0x57   : > { %s1485_s26 = scalar_lea.vmem %s438_s27, 256  ;;  %s1492_s8 = scalar_lea.vmem %s438_s27, 512 }
  0x58   : > { %p1486_p5 = scmp.ne.s32.totalorder %s438_s27, %s1485_s26  ;;  %p1493_p10 = scmp.lt.s32.totalorder %s438_s27, %s438_s27 }
  0x59   : > { %p1494_p11 = scmp.lt.s32.totalorder %s1492_s8, %s1485_s26 }
  0x5a   : > { %p1488_p6 = pnand %p1486_p5, %p1775_p3 }
  0x5b   : > { %p1495_p1 = por %p1494_p11, %p1493_p10 }
  0x5c   : > { %p1489_p8 = pneg %p1488_p6 }
  0x5e   : > { %p1496_p4 = pnand %p1495_p1, %p1489_p8 }
  0x60   : > { %1499 = shalt.err (!%p1496_p4)
}
  0x61   : > { %1331 = dma.hbm_to_vmem [thread:$0]  (!%p1755_p12), %s1988_s2, 256, %s438_s27, %s1765_s18, %s1637_s20, %s1637_s20, %s1638_s30  }
  0x62   : > { %s1641_s7 = smov [#allocation9]   ;;  %s1500_s17 = scalar_lea.hbm %s1989_s3, 256 }
  0x63   : > { %s468_s11 = sshll.u32 %s1641_s7, 4  ;;  %p1501_p2 = scmp.ne.s32.totalorder %s1989_s3, %s1500_s17  ;;  %s469_s11 = int_to_ptr.vmem [resolvable:$true] %s468_s11 }
  0x64   : > { %p1507_p9 = scmp.lt.u32.totalorder %s1500_s17, %s1989_s3 }
  0x65   : > { %p1503_p13 = pnand %p1501_p2, %p1775_p3 }
  0x67   : > { %p1504_p7 = pneg %p1503_p13 }
  0x69   : > { %p1509_p0 = pnand %p1507_p9, %p1504_p7 }
  0x6b   : > { %1512 = shalt.err (!%p1509_p0)
}
  0x6c   : > { %s1513_s27 = scalar_lea.vmem %s469_s11, 256  ;;  %s1520_s18 = scalar_lea.vmem %s469_s11, 512 }
  0x6d   : > { %p1514_p5 = scmp.ne.s32.totalorder %s469_s11, %s1513_s27  ;;  %p1521_p10 = scmp.lt.s32.totalorder %s469_s11, %s469_s11 }
  0x6e   : > { %p1522_p11 = scmp.lt.s32.totalorder %s1520_s18, %s1513_s27 }
  0x6f   : > { %p1516_p6 = pnand %p1514_p5, %p1775_p3 }
  0x70   : > { %p1523_p1 = por %p1522_p11, %p1521_p10 }
  0x71   : > { %p1517_p8 = pneg %p1516_p6 }
  0x73   : > { %p1524_p4 = pnand %p1523_p1, %p1517_p8 }
  0x75   : > { %1527 = shalt.err (!%p1524_p4)
}
  0x76   : > { %1334 = dma.hbm_to_vmem [thread:$0]  (!%p1755_p12), %s1989_s3, 256, %s469_s11, [#allocation10], %s1637_s20, %s1637_s20, %s1638_s30  }
  0x77   : > { %p2015_p2 = scmp.ne.s32.totalorder %s2014_s15, 0 }
  0x78   : > { %p2016_p3 = scmp.eq.s32.totalorder (!%p2015_p2), %s1724_s29, 0 }
  0x79   : > { %546 = sbr.rel (%p2015_p2) target bundleno = 872 (0x368), region = 44 }
  0x80   : > { %1589 = dma.done.wait (%p2016_p3), [#allocation4], 256   ;;  %p2017_p13 = pmov %p2016_p3 }
  0x81   : > { %s557_s9 = sand.u32 1, %s1724_s29   ;;  %p2018_p7 = pmov %p2016_p3 }
  0x82   : > { %1591 = vsyncadd (%p2017_p13), [#allocation4], 4294967040  ;;  %s558_s13 = scalar_lea.sflag [#allocation7], %s557_s9 }
  0x83   : > { %1593 = dma.done.wait (%p2018_p7), %s558_s13, 512   ;;  %p2019_p9 = pmov %p2016_p3 }
  0x84   : > { %p2020_p12 = pmov %p2016_p3 }
  0x85   : > { %1595 = vsyncadd (%p2019_p9), %s558_s13, 4294966784 }
  0x86   : > { %1597 = dma.done.wait (%p2020_p12), [#allocation10], 256   ;;  %p2021_p0 = pmov %p2016_p3 }
  0x87   : > { %s654_s20 = sand.u32 1, %s1610_s22   ;;  %p760_p5 = scmp.ge.s32.totalorder %s1618_s24, 0 }
  0x88   : > { %1599 = vsyncadd (%p2021_p0), [#allocation10], 4294967040  ;;  %s1305_s30 = smul.u32 24, %s654_s20  ;;  %p761_p6 = scmp.lt.s32.totalorder %s1618_s24, 1 }
  0x89   : > { %s764_s15 = sadd.s32 %s1618_s24, %s1622_s25  ;;  %p1293_p11 = scmp.ne.s32.totalorder %s1618_s24, 0 }
  0x8a   : > { %p762_p8 = pnand %p761_p6, %p760_p5  ;;  %s1889_s7 = scalar_lea.vmem [#allocation11], %s1305_s30  ;;  %v1642_v0 = vmov (!%p1293_p11), 0.0  }
  0x8b   : > { %768 = sbr.rel (%p1293_p11) target bundleno = 146 (0x92), region = 64  ;;  %769 = vst [vmem:[#allocation2] sm:$0xff] (!%p1293_p11), %v1642_v0 }
  0x8c   : > { %p763_p10 = pneg %p762_p8 }
  0x92 PF: > { %p770_p1 = scmp.lt.s32.totalorder %s764_s15, 1 }
  0x94   : > { %p771_p4 = pnand %p770_p1, %p763_p10 }
  0x95   : > { %v775_v1 = vld [vmem:[#allocation3] sm:$0xff] (!%p771_p4)  ;;  %v776_v2 = vld [vmem:[#allocation3 + $0x8] sm:$0xff] (!%p771_p4)  ;;  %v783_v9 = vld [vmem:[#allocation2] sm:$0xff] (!%p771_p4) }
  0x96   : > { %774 = sbr.rel (%p771_p4) target bundleno = 160 (0xa0), region = 68  ;;  %v777_v3 = vld [vmem:[#allocation6] sm:$0xff] (!%p771_p4)  ;;  %v778_v4 = vld [vmem:[#allocation6 + $0x8] sm:$0xff] (!%p771_p4) }
  0x97   : > { %v779_v5 = vsub.f32 (!%p771_p4), %v775_v1, %v777_v3  ;;  %v780_v6 = vsub.f32 (!%p771_p4), %v776_v2, %v778_v4 }
  0x99   : > { %v781_v7 = vmul.f32 (!%p771_p4), %v779_v5, %v779_v5  ;;  %v782_v8 = vmul.f32 (!%p771_p4), %v780_v6, %v780_v6 }
  0x9b   : > { %v784_v10 = vadd.f32 (!%p771_p4), %v782_v8, %v781_v7 }
  0x9d   : > { %v785_v11 = vadd.f32 %v784_v10, %v783_v9 }
  0x9f   : > { %786 = vst [vmem:[#allocation2] sm:$0xff] %v785_v11 }
  0xa0 PF: > { %789 = sbr.rel (%p1293_p11) target bundleno = 373 (0x175), region = 72 }
  0xa6   : > { %v790_v12 = vld [vmem:[#allocation2] sm:$0xff] (!%p1293_p11) }
  0xa7   : > { %791 = vadd.xlane.f32.xlu0 %v790_v12 }
 0x134   : > { %v792_v13 = vpop.xlane.xlu0 %791 }
 0x135   : > { %v793_v14 = vrot.slane %v792_v13, 4 }
 0x137   : > { %v794_v15 = vadd.f32 %v793_v14, %v792_v13 }
 0x139   : > { %v795_v16 = vrot.slane %v794_v15, 2 }
 0x13b   : > { %v796_v17 = vadd.f32 %v795_v16, %v794_v15 }
 0x13d   : > { %v797_v18 = vrot.slane %v796_v17, 1 }
 0x13f   : > { %v798_v19 = vadd.f32 %v797_v18, %v796_v17 }
 0x141   : > { %1306 = vpush %v798_v19 }
 0x172   : > { %s1307_s29 = spop %1306 }
 0x173   : > { %v800_v20 = vstv %s1307_s29 }
 0x174   : > { %801 = vst [vmem:[%s1889_s7] sm:$0xff] %v800_v20 }
 0x175 PF: > { %p802_p2 = scmp.ge.s32.totalorder %s1618_s24, 1  ;;  %p803_p3 = scmp.lt.s32.totalorder %s1618_s24, 2 }
 0x176   : > { %s1295_s11 = sadd.s32 4294967295, %s1618_s24  ;;  %p1296_p9 = scmp.ne.s32.totalorder %s1618_s24, 1 }
 0x177   : > { %p804_p13 = pnand %p803_p3, %p802_p2  ;;  %s807_s14 = sadd.s32 %s1622_s25, %s1295_s11  ;;  %v1643_v21 = vmov (!%p1296_p9), 0.0  }
 0x178   : > { %811 = sbr.rel (%p1296_p9) target bundleno = 383 (0x17f), region = 76  ;;  %812 = vst [vmem:[#allocation2] sm:$0xff] (!%p1296_p9), %v1643_v21 }
 0x179   : > { %p805_p7 = pneg %p804_p13 }
 0x17f PF: > { %p813_p12 = scmp.lt.s32.totalorder %s807_s14, 1 }
 0x181   : > { %p814_p0 = pnand %p813_p12, %p805_p7 }
 0x182   : > { %v818_v22 = vld [vmem:[#allocation8] sm:$0xff] (!%p814_p0)  ;;  %v819_v23 = vld [vmem:[#allocation8 + $0x8] sm:$0xff] (!%p814_p0)  ;;  %v826_v30 = vld [vmem:[#allocation2] sm:$0xff] (!%p814_p0) }
 0x183   : > { %817 = sbr.rel (%p814_p0) target bundleno = 397 (0x18d), region = 80  ;;  %v820_v24 = vld [vmem:[#allocation9] sm:$0xff] (!%p814_p0)  ;;  %v821_v25 = vld [vmem:[#allocation9 + $0x8] sm:$0xff] (!%p814_p0) }
 0x184   : > { %v822_v26 = vsub.f32 (!%p814_p0), %v818_v22, %v820_v24  ;;  %v823_v27 = vsub.f32 (!%p814_p0), %v819_v23, %v821_v25 }
 0x186   : > { %v824_v28 = vmul.f32 (!%p814_p0), %v822_v26, %v822_v26  ;;  %v825_v29 = vmul.f32 (!%p814_p0), %v823_v27, %v823_v27 }
 0x188   : > { %v827_v31 = vadd.f32 (!%p814_p0), %v825_v29, %v824_v28 }
 0x18a   : > { %v828_v32 = vadd.f32 %v827_v31, %v826_v30 }
 0x18c   : > { %829 = vst [vmem:[#allocation2] sm:$0xff] %v828_v32 }
 0x18d PF: > { %832 = sbr.rel (%p1296_p9) target bundleno = 610 (0x262), region = 84 }
 0x193   : > { %v833_v33 = vld [vmem:[#allocation2] sm:$0xff] (!%p1296_p9) }
 0x194   : > { %834 = vadd.xlane.f32.xlu0 %v833_v33 }
 0x221   : > { %v835_v34 = vpop.xlane.xlu0 %834 }
 0x222   : > { %v836_v35 = vrot.slane %v835_v34, 4 }
 0x224   : > { %v837_v36 = vadd.f32 %v836_v35, %v835_v34 }
 0x226   : > { %v838_v37 = vrot.slane %v837_v36, 2 }
 0x228   : > { %v839_v38 = vadd.f32 %v838_v37, %v837_v36 }
 0x22a   : > { %v840_v39 = vrot.slane %v839_v38, 1 }
 0x22c   : > { %v841_v40 = vadd.f32 %v840_v39, %v839_v38 }
 0x22e   : > { %1308 = vpush %v841_v40 }
 0x25f   : > { %s1309_s19 = spop %1308 }
 0x260   : > { %v843_v41 = vstv %s1309_s19 }
 0x261   : > { %844 = vst [vmem:[%s1889_s7 + $0x8] sm:$0xff] %v843_v41 }
 0x262 PF: > { %p845_p5 = scmp.ge.s32.totalorder %s1618_s24, 2  ;;  %p846_p6 = scmp.lt.s32.totalorder %s1618_s24, 3 }
 0x263   : > { %s1298_s17 = sadd.s32 4294967294, %s1618_s24  ;;  %p1299_p11 = scmp.ne.s32.totalorder %s1618_s24, 2 }
 0x264   : > { %p847_p8 = pnand %p846_p6, %p845_p5  ;;  %s850_s12 = sadd.s32 %s1622_s25, %s1298_s17  ;;  %v1644_v42 = vmov (!%p1299_p11), 0.0  }
 0x265   : > { %854 = sbr.rel (%p1299_p11) target bundleno = 620 (0x26c), region = 88  ;;  %855 = vst [vmem:[#allocation2] sm:$0xff] (!%p1299_p11), %v1644_v42 }
 0x266   : > { %p848_p10 = pneg %p847_p8 }
 0x26c PF: > { %p856_p1 = scmp.eq.s32.totalorder %s850_s12, 0 }
 0x26e   : > { %p857_p4 = pnand %p856_p1, %p848_p10 }
 0x26f   : > { %v861_v43 = vld [vmem:[%s1990_s4] sm:$0xff] (!%p857_p4)  ;;  %v864_v45 = vlaneseq (!%p857_p4) }
 0x270   : > { %860 = sbr.rel (%p857_p4) target bundleno = 633 (0x279), region = 92  ;;  %v862_v44 = vld [vmem:[%s1991_s5] sm:$0xff] (!%p857_p4) }
 0x271   : > { %v863_v46 = vsub.f32 (!%p857_p4), %v861_v43, %v862_v44  ;;  %v865_v47 = vshrl.u32 (!%p857_p4), %v864_v45, 7  ;;  %v869_v49 = vld [vmem:[#allocation2] sm:$0xff] (!%p857_p4) }
 0x273   : > { %v867_v48 = vmul.f32 (!%p857_p4), %v863_v46, %v863_v46  ;;  %vm866_vm0 = vcmp.lt.s32.totalorder (!%p857_p4), %v865_v47, 4 }
 0x275   : > { %v868_v50 = vsel (!%p857_p4), %vm866_vm0, %v867_v48, 0.0 }
 0x276   : > { %v871_v51 = vadd.f32 (!%p857_p4), %v869_v49, %v868_v50 }
 0x278   : > { %872 = vst [vmem:[#allocation2] sm:$0xff] %v871_v51 }
 0x279 PF: > { %875 = sbr.rel (%p1299_p11) target bundleno = 846 (0x34e), region = 96 }
 0x27f   : > { %v876_v52 = vld [vmem:[#allocation2] sm:$0xff] (!%p1299_p11) }
 0x280   : > { %877 = vadd.xlane.f32.xlu0 %v876_v52 }
 0x30d   : > { %v878_v53 = vpop.xlane.xlu0 %877 }
 0x30e   : > { %v879_v54 = vrot.slane %v878_v53, 4 }
 0x310   : > { %v880_v55 = vadd.f32 %v879_v54, %v878_v53 }
 0x312   : > { %v881_v56 = vrot.slane %v880_v55, 2 }
 0x314   : > { %v882_v57 = vadd.f32 %v881_v56, %v880_v55 }
 0x316   : > { %v883_v58 = vrot.slane %v882_v57, 1 }
 0x318   : > { %v884_v59 = vadd.f32 %v883_v58, %v882_v57 }
 0x31a   : > { %1310 = vpush %v884_v59 }
 0x34b   : > { %s1311_s18 = spop %1310 }
 0x34c   : > { %v886_v60 = vstv %s1311_s18 }
 0x34d   : > { %887 = vst [vmem:[%s1889_s7 + $0x10] sm:$0xff] %v886_v60 }
 0x34e PF: > { %s1304_s24 = smul.u32 384, %s1622_s25  ;;  %s902_s21 = sshll.u32 %s1889_s7, 4  ;;  %s1930_s21 = int_to_ptr.vmem [resolvable:$true] %s902_s21 }
 0x34f   : > { %s1934_s30 = scalar_lea.sflag [#allocation5], %s654_s20  ;;  %s1528_s15 = scalar_lea.vmem %s1930_s21, 384 }
 0x350   : > { %s1928_s13 = scalar_lea.hbm %s1992_s6, %s1304_s24  ;;  %p1529_p2 = scmp.ne.s32.totalorder %s1930_s21, %s1528_s15 }
 0x351   : > { %p2022_p3 = scmp.ne.s32.totalorder %s2005_s10, 0  ;;  %s1645_s25 = smov [#allocation11]  }
 0x352   : > { %s1532_s7 = sshll.u32 %s1645_s25, 4  ;;  %s1533_s7 = int_to_ptr.vmem [resolvable:$false] %s1532_s7 }
 0x353   : > { %p1530_p13 = pnand %p1529_p2, %p2022_p3  ;;  %s1534_s29 = scalar_lea.vmem %s1533_s7, 768 }
 0x354   : > { %p1535_p9 = scmp.lt.s32.totalorder %s1930_s21, %s1533_s7  ;;  %p1536_p12 = scmp.lt.s32.totalorder %s1534_s29, %s1528_s15 }
 0x355   : > { %p1531_p7 = pneg %p1530_p13 }
 0x356   : > { %p1537_p0 = por %p1536_p12, %p1535_p9 }
 0x358   : > { %p1538_p5 = pnand %p1537_p0, %p1531_p7 }
 0x35a   : > { %1541 = shalt.err (!%p1538_p5)
}
 0x35b   : > { %s1542_s20 = scalar_lea.hbm %s1928_s13, 384  ;;  %s1546_s19 = scalar_lea.hbm %s1992_s6, 768 }
 0x35c   : > { %p1543_p6 = scmp.ne.s32.totalorder %s1928_s13, %s1542_s20  ;;  %p1547_p11 = scmp.lt.u32.totalorder %s1928_s13, %s1992_s6 }
 0x35d   : > { %p1548_p1 = scmp.lt.u32.totalorder %s1546_s19, %s1542_s20  ;;  %p1550_p2 = scmp.lt.u32.totalorder %s1542_s20, %s1928_s13 }
 0x35e   : > { %p1544_p8 = pnand %p1543_p6, %p2022_p3 }
 0x35f   : > { %p1549_p4 = por %p1548_p1, %p1547_p11 }
 0x360   : > { %p1545_p10 = pneg %p1544_p8 }
 0x361   : > { %p1551_p13 = por %p1550_p2, %p1549_p4 }
 0x363   : > { %p1552_p7 = pnand %p1551_p13, %p1545_p10 }
 0x365   : > { %1555 = shalt.err (!%p1552_p7)
}
 0x366   : > { %s1646_s16 = smov 128   ;;  %s1647_s26 = smov 8  }
 0x367   : > { %1320 = dma.vmem_to_hbm [thread:$0]  (%p2022_p3), %s1930_s21, 384, %s1928_s13, %s1934_s30, %s1646_s16, %s1646_s16, %s1647_s26  }
 0x368 PF: > { %s2023_s8 = sld [smem:[#allocation16_spill]]  ;;  %s2024_s27 = sld [smem:[#allocation22_spill]] }
 0x369   : > { %p1340_p9 = scmp.ge.s32.totalorder %s1634_s28, 2 }
 0x36e   : > { %s917_s18 = sand.u32 1, %s2023_s8   ;;  %p2025_p12 = scmp.ne.s32.totalorder %s2024_s27, 0 }
 0x36f   : > { %s918_s24 = scalar_lea.sflag [#allocation5], %s917_s18 }
 0x370   : > { %p1336_p0 = pnand %p1340_p9, %p2025_p12 }
 0x372   : > { %1601 = dma.done.wait (!%p1336_p0), %s918_s24, 384  }
 0x373   : > { %1603 = vsyncadd (!%p1336_p0), %s918_s24, 4294966912  ;;  %s28_s28 = sadd.s32 1, %s1634_s28   ;;  %s2026_s23 = sld [smem:[#allocation17_spill]] }
 0x374   : > { %p25_p5 = scmp.ge.s32.totalorder %s28_s28, 8   ;;  %s2027_s9 = sld [smem:[#allocation23_spill]] }
 0x375   : > { %s2028_s24 = sld [smem:[#allocation18_spill]]  ;;  %s2029_s25 = sld [smem:[#allocation19_spill]] }
 0x376   : > { %s2030_s26 = sld [smem:[#allocation20_spill]]  ;;  %s2031_s27 = sld [smem:[#allocation21_spill]] }
 0x377   : > { %s2032_s21 = smov %s1610_s22  ;;  %27 = sbr.rel (!%p25_p5) target bundleno = 11 (0xb), region = 168 }
 0x379   : > { %s2033_s22 = smov %s2026_s23 }
 0x37a   : > { %s2034_s23 = smov %s2027_s9 }
 0x37e   :  { %923 = vsyncpa [#allocation4], 1 }
 0x37f   :  { %925 = vsyncpa [#allocation4 + $0x1], 1 }
 0x380   :  { %926 = vsyncpa [#allocation7], 1 }
 0x381   :  { %928 = vsyncpa [#allocation7 + $0x1], 1 }
 0x382   :  { %929 = vsyncpa [#allocation10], 1 }
 0x383   :  { %931 = vsyncpa [#allocation10 + $0x1], 1 }
 0x384   :  { %932 = vsyncpa [#allocation5], 1 }
 0x385   :  { %934 = vsyncpa [#allocation5 + $0x1], 1 }

</bundles_post_ra>
